<compile_context>
chip_gen: v7x
topology: tpu7x:2x2x1
jax: 0.10.0
libtpu: 0.0.40
codegen_flags: <defaults>
</compile_context>

<pallas_src>
import math
import functools

import jax
import jax.numpy as jnp
from jax.experimental import pallas as pl
from jax.experimental.pallas import tpu as pltpu

EPS = 1e-6


def _gelu_exact(x):
    # nn.GELU() default = exact erf-based GELU.
    return 0.5 * x * (1.0 + jax.lax.erf(x * 0.7071067811865475))


def _gelu_tanh(x):
    # Optional EUP-friendly approximation (not PyTorch-default semantics).
    return jax.nn.gelu(x, approximate=True)


def _layernorm(x, gamma, beta):
    # Two-pass LayerNorm over the last dim (matches nn.LayerNorm, eps=1e-6).
    mu = jnp.mean(x, axis=-1, keepdims=True)
    xc = x - mu
    var = jnp.mean(xc * xc, axis=-1, keepdims=True)
    return xc * jax.lax.rsqrt(var + EPS) * gamma + beta


def mixer_block_kernel(
    x_ref,                        # (bb, S, D) f32
    g1_ref, b1_ref,               # (1, D) norm1 gamma/beta
    tw1_ref, tb1_ref,             # (T, S) [PyTorch (out,in)], (T, 1)
    tw2_ref, tb2_ref,             # (S, T) [PyTorch (out,in)], (S, 1)
    g2_ref, b2_ref,               # (1, D) norm2 gamma/beta
    cw1_ref, cb1_ref,             # (D, C) [(in,out)], (1, C)
    cw2_ref, cb2_ref,             # (C, D) [(in,out)], (1, D)
    o_ref,                        # (bb, S, D)
    x2_ref,                       # scratch: (bb, S, D) f32 residual stream
    *, bb, approx_gelu, channel_gelu_in_compute,
):
    _, S, D = x_ref.shape
    gelu = _gelu_tanh if approx_gelu else _gelu_exact

    # Hoisted, loop-invariant weight loads (emitted once; pl.loop is scf.for,
    # not a Python unroll, so nothing below is replicated per batch row).
    g1 = g1_ref[...]
    be1 = b1_ref[...]
    g2 = g2_ref[...]
    be2 = b2_ref[...]
    tw1 = tw1_ref[...]
    tb1 = tb1_ref[...]
    tw2 = tw2_ref[...]
    tb2 = tb2_ref[...]
    cw1 = cw1_ref[...]
    cb1 = cb1_ref[...]
    cw2 = cw2_ref[...]
    cb2 = cb2_ref[...]
    mdt = tw1.dtype  # matmul operand dtype (f32 or bf16); accumulation is f32

    # ---- token mixing (transpose-free, per batch row, real loop) ----------
    # x2 = x + [W2 @ gelu(W1 @ norm1(x)^T-free form + b1) + b2]
    @pl.loop(0, bb)
    def _(i):
        xi = x_ref[i]                                             # (S, D) f32
        xn = _layernorm(xi, g1, be1)                              # (S, D) f32
        h = jnp.dot(tw1, xn.astype(mdt),
                    preferred_element_type=jnp.float32) + tb1     # (T, D) f32
        h = gelu(h)
        tok = jnp.dot(tw2, h.astype(mdt),
                      preferred_element_type=jnp.float32) + tb2   # (S, D) f32
        x2_ref[i] = xi + tok                                      # f32 residual

    # ---- channel mixing, merged over the whole (bb*S, D) slab -------------
    x2 = x2_ref[...].reshape(bb * S, D)                           # f32
    zn = _layernorm(x2, g2, be2)                                  # (bb*S, D)
    h2 = jnp.dot(zn.astype(mdt), cw1,
                 preferred_element_type=jnp.float32) + cb1        # (bb*S, C)
    if channel_gelu_in_compute:
        h2 = gelu(h2.astype(mdt))       # bf16 GELU on the largest tensor
    else:
        h2 = gelu(h2)
    ch = jnp.dot(h2.astype(mdt), cw2,
                 preferred_element_type=jnp.float32) + cb2        # (bb*S, D)

    o_ref[...] = (x2 + ch).reshape(bb, S, D).astype(o_ref.dtype)


def _physical_vmem_bytes():
    try:
        info = pltpu.get_tpu_info()
        cap = getattr(info, "vmem_capacity_bytes", None)
        if cap:
            return int(cap)
    except Exception:
        pass
    return 64 << 20  # conservative: v7x per-TensorCore VMEM


def mixer_block(x, params, *, compute_dtype=jnp.float32, approx_gelu=False,
                channel_gelu_in_compute=None):
    """x: (B, S, D) float32. compute_dtype controls matmul-operand precision.
    channel_gelu_in_compute=None -> auto (True iff compute_dtype != float32;
    pass False explicitly on v5e, whose VPU has no native bf16)."""
    B, S, D = x.shape
    T = params["tok_w1"].shape[0]
    C = params["ch_w1"].shape[1]

    cd = jnp.dtype(compute_dtype)
    if channel_gelu_in_compute is None:
        channel_gelu_in_compute = (cd != jnp.dtype(jnp.float32))

    # Cast matmul weights once in the wrapper (halves their DMA bytes for bf16).
    tok_w1 = params["tok_w1"].astype(cd)
    tok_w2 = params["tok_w2"].astype(cd)
    ch_w1 = params["ch_w1"].astype(cd)
    ch_w2 = params["ch_w2"].astype(cd)

    small = (params["g1"], params["b1"], params["tok_b1"], params["tok_b2"],
             params["g2"], params["b2"], params["ch_b1"], params["ch_b2"])
    weight_bytes = sum(int(a.size) * a.dtype.itemsize
                       for a in (tok_w1, tok_w2, ch_w1, ch_w2) + small)

    xitem = x.dtype.itemsize

    def est_vmem(bb):
        io = 2 * 2 * bb * S * D * xitem            # in+out x slabs, 2-deep each
        x2s = bb * S * D * 4                       # f32 residual scratch
        acts = bb * S * (3 * D + 2 * C) * 4        # zn / h2 / ch live values
        tok_tmp = (T * D + S * D + T * S) * 4      # per-row token temporaries
        return weight_bytes + io + x2s + acts + tok_tmp + (2 << 20)

    phys = _physical_vmem_bytes()
    budget = int(phys * 0.7)

    # Batch blocking derived from the VMEM budget; keep enough grid steps to
    # feed both v7x TensorCores and let BlockSpec double-buffering overlap the
    # x/out DMA with compute (aim for >= min(8, B) steps).
    divisors = [d for d in range(1, B + 1) if B % d == 0]
    fitting = [d for d in divisors if est_vmem(d) <= budget] or [1]
    min_steps = min(8, B)
    bb = max(d for d in fitting if B // d >= min_steps)
    num_blocks = B // bb

    est = est_vmem(bb)
    # Only ever RAISE the scoped-VMEM limit (never below the 32 MiB v6e/v7x
    # default); cap below physical VMEM.
    vmem_limit = int(min(max(est, 32 << 20), phys)) if est > (16 << 20) else None

    def wspec(shape):
        # Full-extent, grid-invariant weight block: single-buffered.
        n = len(shape)
        return pl.BlockSpec(shape, lambda i, _n=n: (0,) * _n,
                            pipeline_mode=pl.Buffered(1))

    in_specs = [
        pl.BlockSpec((bb, S, D), lambda i: (i, 0, 0)),   # x (double-buffered)
        wspec((1, D)), wspec((1, D)),                    # norm1 gamma/beta
        wspec((T, S)), wspec((T, 1)),                    # token fc1 (out,in)
        wspec((S, T)), wspec((S, 1)),                    # token fc2 (out,in)
        wspec((1, D)), wspec((1, D)),                    # norm2 gamma/beta
        wspec((D, C)), wspec((1, C)),                    # channel fc1 (in,out)
        wspec((C, D)), wspec((1, D)),                    # channel fc2 (in,out)
    ]
    out_specs = pl.BlockSpec((bb, S, D), lambda i: (i, 0, 0))

    return pl.pallas_call(
        functools.partial(
            mixer_block_kernel, bb=bb, approx_gelu=approx_gelu,
            channel_gelu_in_compute=channel_gelu_in_compute),
        out_shape=jax.ShapeDtypeStruct((B, S, D), x.dtype),
        grid_spec=pltpu.PrefetchScalarGridSpec(
            num_scalar_prefetch=0,
            grid=(num_blocks,),
            in_specs=in_specs,
            out_specs=out_specs,
            scratch_shapes=[pltpu.VMEM((bb, S, D), jnp.float32)],
        ),
        compiler_params=pltpu.CompilerParams(
            dimension_semantics=("parallel",),
            vmem_limit_bytes=vmem_limit),
    )(
        x,
        params["g1"], params["b1"],
        tok_w1, params["tok_b1"],
        tok_w2, params["tok_b2"],
        params["g2"], params["b2"],
        ch_w1, params["ch_b1"],
        ch_w2, params["ch_b2"],
    )


def init_params(key, dim, seq_len, token_width, channel_width):
    """Deterministic synthetic init mimicking nn.Linear/nn.LayerNorm shapes.
    Token-MLP weights stay in PyTorch (out,in) layout; channel-MLP weights are
    stored pre-transposed (in,out)."""
    ks = jax.random.split(key, 8)

    def linear(kw, kb, fan_in, w_shape, b_shape):
        bound = 1.0 / math.sqrt(fan_in)
        w = jax.random.uniform(kw, w_shape, jnp.float32, -bound, bound)
        b = jax.random.uniform(kb, b_shape, jnp.float32, -bound, bound)
        return w, b

    tok_w1, tok_b1 = linear(ks[0], ks[1], seq_len,
                            (token_width, seq_len), (token_width, 1))
    tok_w2, tok_b2 = linear(ks[2], ks[3], token_width,
                            (seq_len, token_width), (seq_len, 1))
    ch_w1, ch_b1 = linear(ks[4], ks[5], dim,
                          (dim, channel_width), (1, channel_width))
    ch_w2, ch_b2 = linear(ks[6], ks[7], channel_width,
                          (channel_width, dim), (1, dim))

    return dict(
        g1=jnp.ones((1, dim), jnp.float32), b1=jnp.zeros((1, dim), jnp.float32),
        tok_w1=tok_w1, tok_b1=tok_b1, tok_w2=tok_w2, tok_b2=tok_b2,
        g2=jnp.ones((1, dim), jnp.float32), b2=jnp.zeros((1, dim), jnp.float32),
        ch_w1=ch_w1, ch_b1=ch_b1, ch_w2=ch_w2, ch_b2=ch_b2,
    )


def mixer_block_ref(x, p, compute_dtype=jnp.float32, channel_gelu_in_compute=None):
    """Pure-JAX reference (PyTorch semantics); mirrors the kernel's matmul
    operand precision and channel-GELU dtype so both paths can be validated."""
    cd = jnp.dtype(compute_dtype)
    if channel_gelu_in_compute is None:
        channel_gelu_in_compute = (cd != jnp.dtype(jnp.float32))

    def ln(v, g, b):
        mu = jnp.mean(v, axis=-1, keepdims=True)
        vc = v - mu
        var = jnp.mean(vc * vc, axis=-1, keepdims=True)
        return vc * jax.lax.rsqrt(var + EPS) * g + b

    xn = ln(x, p["g1"], p["b1"])                                        # (B,S,D)
    h = jnp.einsum('ts,bsd->btd', p["tok_w1"].astype(cd), xn.astype(cd),
                   preferred_element_type=jnp.float32) + p["tok_b1"]    # (B,T,D)
    h = _gelu_exact(h)
    tok = jnp.einsum('st,btd->bsd', p["tok_w2"].astype(cd), h.astype(cd),
                     preferred_element_type=jnp.float32) + p["tok_b2"]  # (B,S,D)
    x2 = x + tok
    zn = ln(x2, p["g2"], p["b2"])
    h2 = jnp.einsum('bsd,dc->bsc', zn.astype(cd), p["ch_w1"].astype(cd),
                    preferred_element_type=jnp.float32) + p["ch_b1"]    # (B,S,C)
    h2 = _gelu_exact(h2.astype(cd)) if channel_gelu_in_compute else _gelu_exact(h2)
    ch = jnp.einsum('bsc,cd->bsd', h2.astype(cd), p["ch_w2"].astype(cd),
                    preferred_element_type=jnp.float32) + p["ch_b2"]    # (B,S,D)
    return x2 + ch


if __name__ == "__main__":
    B, S, D = 2, 8, 32          # (batch, seq_len, dim)
    T, C = 16, 64               # token / channel mixing MLP widths

    key = jax.random.PRNGKey(0)
    kx, kp = jax.random.split(key)
    x = jax.random.normal(kx, (B, S, D), jnp.float32)
    params = init_params(kp, D, S, T, C)

    # --- exact f32 path (matches PyTorch nn.GELU / nn.LayerNorm semantics) ---
    out = jax.block_until_ready(mixer_block(x, params, compute_dtype=jnp.float32))
    ref = mixer_block_ref(x, params, compute_dtype=jnp.float32)
    assert out.shape == (B, S, D)
    assert jnp.allclose(out, ref, atol=1e-4, rtol=1e-4), "f32 mismatch vs reference"

    # --- bf16-matmul fast path (f32 accumulation / residual / LN stats) ---
    out_bf = jax.block_until_ready(mixer_block(x, params, compute_dtype=jnp.bfloat16))
    ref_bf = mixer_block_ref(x, params, compute_dtype=jnp.bfloat16)
    assert jnp.allclose(out_bf, ref_bf, atol=1e-2, rtol=1e-2), "bf16 mismatch vs bf16 reference"
    assert jnp.allclose(out_bf, ref, atol=1e-1, rtol=1e-1), "bf16 path grossly off f32 reference"

    print("KERNEL_OK")
</pallas_src>

<mosaic_0001>
module attributes {stable_mosaic.version = 11 : i64} {
  func.func @mixer_block_kernel(%arg0: i32, %arg1: memref<1x8x32xf32, #tpu.memory_space<vmem>>, %arg2: memref<1x32xf32, #tpu.memory_space<vmem>>, %arg3: memref<1x32xf32, #tpu.memory_space<vmem>>, %arg4: memref<16x8xf32, #tpu.memory_space<vmem>>, %arg5: memref<16x1xf32, #tpu.memory_space<vmem>>, %arg6: memref<8x16xf32, #tpu.memory_space<vmem>>, %arg7: memref<8x1xf32, #tpu.memory_space<vmem>>, %arg8: memref<1x32xf32, #tpu.memory_space<vmem>>, %arg9: memref<1x32xf32, #tpu.memory_space<vmem>>, %arg10: memref<32x64xf32, #tpu.memory_space<vmem>>, %arg11: memref<1x64xf32, #tpu.memory_space<vmem>>, %arg12: memref<64x32xf32, #tpu.memory_space<vmem>>, %arg13: memref<1x32xf32, #tpu.memory_space<vmem>>, %arg14: memref<1x8x32xf32, #tpu.memory_space<vmem>>, %arg15: memref<1x8x32xf32, #tpu.memory_space<vmem>>) attributes {dimension_semantics = [#tpu.dimension_semantics<parallel>], iteration_bounds = array<i64: 2>, scalar_prefetch = 0 : i64, scratch_operands = 1 : i64, tpu.core_type = #tpu.core_type<tc>, window_params = [{transform_indices = @transform_0, window_bounds = array<i64: 1, 8, 32>}, {pipeline_mode = #tpu.pipeline_mode<synchronous>, transform_indices = @transform_1, window_bounds = array<i64: 1, 32>}, {pipeline_mode = #tpu.pipeline_mode<synchronous>, transform_indices = @transform_2, window_bounds = array<i64: 1, 32>}, {pipeline_mode = #tpu.pipeline_mode<synchronous>, transform_indices = @transform_3, window_bounds = array<i64: 16, 8>}, {pipeline_mode = #tpu.pipeline_mode<synchronous>, transform_indices = @transform_4, window_bounds = array<i64: 16, 1>}, {pipeline_mode = #tpu.pipeline_mode<synchronous>, transform_indices = @transform_5, window_bounds = array<i64: 8, 16>}, {pipeline_mode = #tpu.pipeline_mode<synchronous>, transform_indices = @transform_6, window_bounds = array<i64: 8, 1>}, {pipeline_mode = #tpu.pipeline_mode<synchronous>, transform_indices = @transform_7, window_bounds = array<i64: 1, 32>}, {pipeline_mode = #tpu.pipeline_mode<synchronous>, transform_indices = @transform_8, window_bounds = array<i64: 1, 32>}, {pipeline_mode = #tpu.pipeline_mode<synchronous>, transform_indices = @transform_9, window_bounds = array<i64: 32, 64>}, {pipeline_mode = #tpu.pipeline_mode<synchronous>, transform_indices = @transform_10, window_bounds = array<i64: 1, 64>}, {pipeline_mode = #tpu.pipeline_mode<synchronous>, transform_indices = @transform_11, window_bounds = array<i64: 64, 32>}, {pipeline_mode = #tpu.pipeline_mode<synchronous>, transform_indices = @transform_12, window_bounds = array<i64: 1, 32>}, {transform_indices = @transform_13, window_bounds = array<i64: 1, 8, 32>}]} {
    %c0 = arith.constant 0 : index
    %c0_0 = arith.constant 0 : index
    %0 = vector.load %arg2[%c0, %c0_0] : memref<1x32xf32, #tpu.memory_space<vmem>>, vector<1x32xf32>
    %c0_1 = arith.constant 0 : index
    %c0_2 = arith.constant 0 : index
    %1 = vector.load %arg3[%c0_1, %c0_2] : memref<1x32xf32, #tpu.memory_space<vmem>>, vector<1x32xf32>
    %c0_3 = arith.constant 0 : index
    %c0_4 = arith.constant 0 : index
    %2 = vector.load %arg8[%c0_3, %c0_4] : memref<1x32xf32, #tpu.memory_space<vmem>>, vector<1x32xf32>
    %c0_5 = arith.constant 0 : index
    %c0_6 = arith.constant 0 : index
    %3 = vector.load %arg9[%c0_5, %c0_6] : memref<1x32xf32, #tpu.memory_space<vmem>>, vector<1x32xf32>
    %c0_7 = arith.constant 0 : index
    %c0_8 = arith.constant 0 : index
    %4 = vector.load %arg4[%c0_7, %c0_8] : memref<16x8xf32, #tpu.memory_space<vmem>>, vector<16x8xf32>
    %c0_9 = arith.constant 0 : index
    %c0_10 = arith.constant 0 : index
    %5 = vector.load %arg5[%c0_9, %c0_10] : memref<16x1xf32, #tpu.memory_space<vmem>>, vector<16x1xf32>
    %c0_11 = arith.constant 0 : index
    %c0_12 = arith.constant 0 : index
    %6 = vector.load %arg6[%c0_11, %c0_12] : memref<8x16xf32, #tpu.memory_space<vmem>>, vector<8x16xf32>
    %c0_13 = arith.constant 0 : index
    %c0_14 = arith.constant 0 : index
    %7 = vector.load %arg7[%c0_13, %c0_14] : memref<8x1xf32, #tpu.memory_space<vmem>>, vector<8x1xf32>
    %c0_15 = arith.constant 0 : index
    %c0_16 = arith.constant 0 : index
    %8 = vector.load %arg10[%c0_15, %c0_16] : memref<32x64xf32, #tpu.memory_space<vmem>>, vector<32x64xf32>
    %c0_17 = arith.constant 0 : index
    %c0_18 = arith.constant 0 : index
    %9 = vector.load %arg11[%c0_17, %c0_18] : memref<1x64xf32, #tpu.memory_space<vmem>>, vector<1x64xf32>
    %c0_19 = arith.constant 0 : index
    %c0_20 = arith.constant 0 : index
    %10 = vector.load %arg12[%c0_19, %c0_20] : memref<64x32xf32, #tpu.memory_space<vmem>>, vector<64x32xf32>
    %c0_21 = arith.constant 0 : index
    %c0_22 = arith.constant 0 : index
    %11 = vector.load %arg13[%c0_21, %c0_22] : memref<1x32xf32, #tpu.memory_space<vmem>>, vector<1x32xf32>
    %c0_i32 = arith.constant 0 : i32
    %c1_i32 = arith.constant 1 : i32
    %12 = arith.muli %c0_i32, %c1_i32 : i32
    %c0_i32_23 = arith.constant 0 : i32
    %13 = arith.addi %c0_i32_23, %12 : i32
    %14 = arith.index_cast %13 : i32 to index
    %c0_24 = arith.constant 0 : index
    %c0_25 = arith.constant 0 : index
    %15 = vector.load %arg1[%14, %c0_24, %c0_25] : memref<1x8x32xf32, #tpu.memory_space<vmem>>, vector<1x8x32xf32>
    %16 = vector.shape_cast %15 : vector<1x8x32xf32> to vector<8x32xf32>
    %cst = arith.constant dense<0.000000e+00> : vector<8xf32>
    %17 = vector.multi_reduction <add>, %16, %cst [1] : vector<8x32xf32> to vector<8xf32>
    %18 = vector.shape_cast %17 : vector<8xf32> to vector<8x1xf32>
    %cst_26 = arith.constant 3.200000e+01 : f32
    %19 = vector.broadcast %cst_26 : f32 to vector<8x1xf32>
    %20 = arith.divf %18, %19 : vector<8x1xf32>
    %21 = vector.broadcast %20 : vector<8x1xf32> to vector<8x32xf32>
    %22 = arith.subf %16, %21 : vector<8x32xf32>
    %23 = arith.mulf %22, %22 : vector<8x32xf32>
    %cst_27 = arith.constant dense<0.000000e+00> : vector<8xf32>
    %24 = vector.multi_reduction <add>, %23, %cst_27 [1] : vector<8x32xf32> to vector<8xf32>
    %25 = vector.shape_cast %24 : vector<8xf32> to vector<8x1xf32>
    %cst_28 = arith.constant 3.200000e+01 : f32
    %26 = vector.broadcast %cst_28 : f32 to vector<8x1xf32>
    %27 = arith.divf %25, %26 : vector<8x1xf32>
    %cst_29 = arith.constant 9.99999997E-7 : f32
    %28 = vector.broadcast %cst_29 : f32 to vector<8x1xf32>
    %29 = arith.addf %27, %28 : vector<8x1xf32>
    %30 = math.rsqrt %29 : vector<8x1xf32>
    %31 = vector.broadcast %30 : vector<8x1xf32> to vector<8x32xf32>
    %32 = arith.mulf %22, %31 : vector<8x32xf32>
    %33 = vector.broadcast %0 : vector<1x32xf32> to vector<8x32xf32>
    %34 = arith.mulf %32, %33 : vector<8x32xf32>
    %35 = vector.broadcast %1 : vector<1x32xf32> to vector<8x32xf32>
    %36 = arith.addf %34, %35 : vector<8x32xf32>
    %cst_30 = arith.constant dense<0.000000e+00> : vector<16x32xf32>
    %37 = tpu.matmul %4, %36, %cst_30 {dimension_numbers = #tpu.dot_dimension_numbers<[1], [0], [0], [1], [0, 0, 1, 1], [], []>} : vector<16x8xf32>, vector<8x32xf32>, vector<16x32xf32> -> vector<16x32xf32>
    %38 = vector.broadcast %5 : vector<16x1xf32> to vector<16x32xf32>
    %39 = arith.addf %37, %38 : vector<16x32xf32>
    %cst_31 = arith.constant 5.000000e-01 : f32
    %40 = vector.broadcast %cst_31 : f32 to vector<16x32xf32>
    %41 = arith.mulf %40, %39 : vector<16x32xf32>
    %cst_32 = arith.constant 0.707106769 : f32
    %42 = vector.broadcast %cst_32 : f32 to vector<16x32xf32>
    %43 = arith.mulf %39, %42 : vector<16x32xf32>
    %44 = math.erf %43 : vector<16x32xf32>
    %cst_33 = arith.constant 1.000000e+00 : f32
    %45 = vector.broadcast %cst_33 : f32 to vector<16x32xf32>
    %46 = arith.addf %45, %44 : vector<16x32xf32>
    %47 = arith.mulf %41, %46 : vector<16x32xf32>
    %cst_34 = arith.constant dense<0.000000e+00> : vector<8x32xf32>
    %48 = tpu.matmul %6, %47, %cst_34 {dimension_numbers = #tpu.dot_dimension_numbers<[1], [0], [0], [1], [0, 0, 1, 1], [], []>} : vector<8x16xf32>, vector<16x32xf32>, vector<8x32xf32> -> vector<8x32xf32>
    %49 = vector.broadcast %7 : vector<8x1xf32> to vector<8x32xf32>
    %50 = arith.addf %48, %49 : vector<8x32xf32>
    %51 = arith.addf %16, %50 : vector<8x32xf32>
    %52 = arith.index_cast %13 : i32 to index
    %c0_35 = arith.constant 0 : index
    %c0_36 = arith.constant 0 : index
    %53 = vector.load %arg15[%52, %c0_35, %c0_36] : memref<1x8x32xf32, #tpu.memory_space<vmem>>, vector<1x8x32xf32>
    %54 = vector.shape_cast %53 : vector<1x8x32xf32> to vector<8x32xf32>
    %55 = vector.shape_cast %51 : vector<8x32xf32> to vector<1x8x32xf32>
    tpu.vector_store %arg15[%52, %c0_35, %c0_36], %55 {strides = array<i32>} : memref<1x8x32xf32, #tpu.memory_space<vmem>>, vector<1x8x32xf32>,
    %c1_i32_37 = arith.constant 1 : i32
    %c0_38 = arith.constant 0 : index
    %c0_39 = arith.constant 0 : index
    %c0_40 = arith.constant 0 : index
    %56 = vector.load %arg15[%c0_38, %c0_39, %c0_40] : memref<1x8x32xf32, #tpu.memory_space<vmem>>, vector<1x8x32xf32>
    %57 = vector.shape_cast %56 : vector<1x8x32xf32> to vector<8x32xf32>
    %cst_41 = arith.constant dense<0.000000e+00> : vector<8xf32>
    %58 = vector.multi_reduction <add>, %57, %cst_41 [1] : vector<8x32xf32> to vector<8xf32>
    %59 = vector.shape_cast %58 : vector<8xf32> to vector<8x1xf32>
    %cst_42 = arith.constant 3.200000e+01 : f32
    %60 = vector.broadcast %cst_42 : f32 to vector<8x1xf32>
    %61 = arith.divf %59, %60 : vector<8x1xf32>
    %62 = vector.broadcast %61 : vector<8x1xf32> to vector<8x32xf32>
    %63 = arith.subf %57, %62 : vector<8x32xf32>
    %64 = arith.mulf %63, %63 : vector<8x32xf32>
    %cst_43 = arith.constant dense<0.000000e+00> : vector<8xf32>
    %65 = vector.multi_reduction <add>, %64, %cst_43 [1] : vector<8x32xf32> to vector<8xf32>
    %66 = vector.shape_cast %65 : vector<8xf32> to vector<8x1xf32>
    %cst_44 = arith.constant 3.200000e+01 : f32
    %67 = vector.broadcast %cst_44 : f32 to vector<8x1xf32>
    %68 = arith.divf %66, %67 : vector<8x1xf32>
    %cst_45 = arith.constant 9.99999997E-7 : f32
    %69 = vector.broadcast %cst_45 : f32 to vector<8x1xf32>
    %70 = arith.addf %68, %69 : vector<8x1xf32>
    %71 = math.rsqrt %70 : vector<8x1xf32>
    %72 = vector.broadcast %71 : vector<8x1xf32> to vector<8x32xf32>
    %73 = arith.mulf %63, %72 : vector<8x32xf32>
    %74 = vector.broadcast %2 : vector<1x32xf32> to vector<8x32xf32>
    %75 = arith.mulf %73, %74 : vector<8x32xf32>
    %76 = vector.broadcast %3 : vector<1x32xf32> to vector<8x32xf32>
    %77 = arith.addf %75, %76 : vector<8x32xf32>
    %cst_46 = arith.constant dense<0.000000e+00> : vector<8x64xf32>
    %78 = tpu.matmul %77, %8, %cst_46 {dimension_numbers = #tpu.dot_dimension_numbers<[1], [0], [0], [1], [0, 0, 1, 1], [], []>} : vector<8x32xf32>, vector<32x64xf32>, vector<8x64xf32> -> vector<8x64xf32>
    %79 = vector.broadcast %9 : vector<1x64xf32> to vector<8x64xf32>
    %80 = arith.addf %78, %79 : vector<8x64xf32>
    %cst_47 = arith.constant 5.000000e-01 : f32
    %81 = vector.broadcast %cst_47 : f32 to vector<8x64xf32>
    %82 = arith.mulf %81, %80 : vector<8x64xf32>
    %cst_48 = arith.constant 0.707106769 : f32
    %83 = vector.broadcast %cst_48 : f32 to vector<8x64xf32>
    %84 = arith.mulf %80, %83 : vector<8x64xf32>
    %85 = math.erf %84 : vector<8x64xf32>
    %cst_49 = arith.constant 1.000000e+00 : f32
    %86 = vector.broadcast %cst_49 : f32 to vector<8x64xf32>
    %87 = arith.addf %86, %85 : vector<8x64xf32>
    %88 = arith.mulf %82, %87 : vector<8x64xf32>
    %cst_50 = arith.constant dense<0.000000e+00> : vector<8x32xf32>
    %89 = tpu.matmul %88, %10, %cst_50 {dimension_numbers = #tpu.dot_dimension_numbers<[1], [0], [0], [1], [0, 0, 1, 1], [], []>} : vector<8x64xf32>, vector<64x32xf32>, vector<8x32xf32> -> vector<8x32xf32>
    %90 = vector.broadcast %11 : vector<1x32xf32> to vector<8x32xf32>
    %91 = arith.addf %89, %90 : vector<8x32xf32>
    %92 = arith.addf %57, %91 : vector<8x32xf32>
    %93 = vector.shape_cast %92 : vector<8x32xf32> to vector<1x8x32xf32>
    %c0_51 = arith.constant 0 : index
    %c0_52 = arith.constant 0 : index
    %c0_53 = arith.constant 0 : index
    %94 = vector.load %arg14[%c0_51, %c0_52, %c0_53] : memref<1x8x32xf32, #tpu.memory_space<vmem>>, vector<1x8x32xf32>
    tpu.vector_store %arg14[%c0_51, %c0_52, %c0_53], %93 {strides = array<i32>} : memref<1x8x32xf32, #tpu.memory_space<vmem>>, vector<1x8x32xf32>,
    return
  }
  func.func @transform_0(%arg0: i32) -> (i32, i32, i32) {
    %c0_i32 = arith.constant 0 : i32
    %c0_i32_0 = arith.constant 0 : i32
    %c0_i32_1 = arith.constant 0 : i32
    return %arg0, %c0_i32, %c0_i32_0 : i32, i32, i32
  }
  func.func @transform_1(%arg0: i32) -> (i32, i32) {
    %c0_i32 = arith.constant 0 : i32
    %c0_i32_0 = arith.constant 0 : i32
    %c0_i32_1 = arith.constant 0 : i32
    return %c0_i32, %c0_i32_0 : i32, i32
  }
  func.func @transform_2(%arg0: i32) -> (i32, i32) {
    %c0_i32 = arith.constant 0 : i32
    %c0_i32_0 = arith.constant 0 : i32
    %c0_i32_1 = arith.constant 0 : i32
    return %c0_i32, %c0_i32_0 : i32, i32
  }
  func.func @transform_3(%arg0: i32) -> (i32, i32) {
    %c0_i32 = arith.constant 0 : i32
    %c0_i32_0 = arith.constant 0 : i32
    %c0_i32_1 = arith.constant 0 : i32
    return %c0_i32, %c0_i32_0 : i32, i32
  }
  func.func @transform_4(%arg0: i32) -> (i32, i32) {
    %c0_i32 = arith.constant 0 : i32
    %c0_i32_0 = arith.constant 0 : i32
    %c0_i32_1 = arith.constant 0 : i32
    return %c0_i32, %c0_i32_0 : i32, i32
  }
  func.func @transform_5(%arg0: i32) -> (i32, i32) {
    %c0_i32 = arith.constant 0 : i32
    %c0_i32_0 = arith.constant 0 : i32
    %c0_i32_1 = arith.constant 0 : i32
    return %c0_i32, %c0_i32_0 : i32, i32
  }
  func.func @transform_6(%arg0: i32) -> (i32, i32) {
    %c0_i32 = arith.constant 0 : i32
    %c0_i32_0 = arith.constant 0 : i32
    %c0_i32_1 = arith.constant 0 : i32
    return %c0_i32, %c0_i32_0 : i32, i32
  }
  func.func @transform_7(%arg0: i32) -> (i32, i32) {
    %c0_i32 = arith.constant 0 : i32
    %c0_i32_0 = arith.constant 0 : i32
    %c0_i32_1 = arith.constant 0 : i32
    return %c0_i32, %c0_i32_0 : i32, i32
  }
  func.func @transform_8(%arg0: i32) -> (i32, i32) {
    %c0_i32 = arith.constant 0 : i32
    %c0_i32_0 = arith.constant 0 : i32
    %c0_i32_1 = arith.constant 0 : i32
    return %c0_i32, %c0_i32_0 : i32, i32
  }
  func.func @transform_9(%arg0: i32) -> (i32, i32) {
    %c0_i32 = arith.constant 0 : i32
    %c0_i32_0 = arith.constant 0 : i32
    %c0_i32_1 = arith.constant 0 : i32
    return %c0_i32, %c0_i32_0 : i32, i32
  }
  func.func @transform_10(%arg0: i32) -> (i32, i32) {
    %c0_i32 = arith.constant 0 : i32
    %c0_i32_0 = arith.constant 0 : i32
    %c0_i32_1 = arith.constant 0 : i32
    return %c0_i32, %c0_i32_0 : i32, i32
  }
  func.func @transform_11(%arg0: i32) -> (i32, i32) {
    %c0_i32 = arith.constant 0 : i32
    %c0_i32_0 = arith.constant 0 : i32
    %c0_i32_1 = arith.constant 0 : i32
    return %c0_i32, %c0_i32_0 : i32, i32
  }
  func.func @transform_12(%arg0: i32) -> (i32, i32) {
    %c0_i32 = arith.constant 0 : i32
    %c0_i32_0 = arith.constant 0 : i32
    %c0_i32_1 = arith.constant 0 : i32
    return %c0_i32, %c0_i32_0 : i32, i32
  }
  func.func @transform_13(%arg0: i32) -> (i32, i32, i32) {
    %c0_i32 = arith.constant 0 : i32
    %c0_i32_0 = arith.constant 0 : i32
    %c0_i32_1 = arith.constant 0 : i32
    return %arg0, %c0_i32, %c0_i32_0 : i32, i32, i32
  }
}

</mosaic_0001>

<bundles_post_ra>
// kernel: tpu_custom_call.1
= control target key start
LH: loop header
LB: loop body
LE: loop exit
PB: predicated region body
PF: predicated region fallthrough
CT: control target
= control target key end

     0   :  { %s1439_s0 = inlined_call_operand.vmem [shape: f32[2,8,32], index: 0, kind: input, shape index: {}]   ;;  %s1440_s1 = inlined_call_operand.vmem [shape: f32[1,32], index: 1, kind: input, shape index: {}]   ;;  %s1441_s2 = inlined_call_operand.vmem [shape: f32[1,32], index: 2, kind: input, shape index: {}]   ;;  %s1442_s3 = inlined_call_operand.vmem [shape: f32[16,8], index: 3, kind: input, shape index: {}]   ;;  %s1443_s4 = inlined_call_operand.vmem [shape: f32[16,1], index: 4, kind: input, shape index: {}]   ;;  %s1444_s5 = inlined_call_operand.vmem [shape: f32[8,16], index: 5, kind: input, shape index: {}]   ;;  %s1445_s6 = inlined_call_operand.vmem [shape: f32[8,1], index: 6, kind: input, shape index: {}]   ;;  %s1446_s7 = inlined_call_operand.vmem [shape: f32[1,32], index: 7, kind: input, shape index: {}]   ;;  %s1447_s8 = inlined_call_operand.vmem [shape: f32[1,32], index: 8, kind: input, shape index: {}]   ;;  %s1448_s9 = inlined_call_operand.vmem [shape: f32[32,64], index: 9, kind: input, shape index: {}]   ;;  %s1449_s10 = inlined_call_operand.vmem [shape: f32[1,64], index: 10, kind: input, shape index: {}]   ;;  %s1450_s11 = inlined_call_operand.vmem [shape: f32[64,32], index: 11, kind: input, shape index: {}]   ;;  %s1451_s12 = inlined_call_operand.vmem [shape: f32[1,32], index: 12, kind: input, shape index: {}]   ;;  %s1452_s13 = inlined_call_operand.hbm [shape: f32[2,8,32], index: 13, kind: output, shape index: {}]  }
   0x1   :  { %1453 = sst [smem:[#allocation6_spill]] %s1439_s0 }
   0x2   :  { %1454 = sst [smem:[#allocation7_spill]] %s1440_s1 }
   0x3   :  { %1455 = sst [smem:[#allocation8_spill]] %s1441_s2 }
   0x4   :  { %18 = vsyncpa [#allocation4], 0 }
   0x5   :  { %20 = vsyncpa [#allocation4 + $0x1], 0  ;;  %s1238_s25 = smov 0   ;;  %s1240_s26 = smov 0  }
   0x6   :  { %s1242_s27 = smov 0   ;;  %s1244_s28 = smov 0  }
   0x7 LB: > { %s1259_s29 = sadd.s32 4294967295, %s1161_s28   ;;  %s940_s30 = sadd.s32 4294967294, %s1161_s28   ;;  %s1161_s28 = sphi %s1244_s28, %s1464_s28   ;;  %s1157_s27 = sphi %s1242_s27, %s1463_s27   ;;  %s1153_s26 = sphi %s1240_s26, %s1462_s26   ;;  %s1149_s25 = sphi %s1238_s25, %s1461_s25  }
   0x8   : > { %s1263_s14 = sadd.s32 1, %s1161_s28   ;;  %s311_s15 = sadd.s32 1, %s1157_s27 }
   0x9   : > { %s308_s16 = ssub.s32 %s1161_s28, %s1263_s14  ;;  %p321_p0 = scmp.ne.s32.totalorder %s1157_s27, %s1153_s26 }
   0xa   : > { %p309_p1 = scmp.eq.s32.totalorder %s308_s16, 0  ;;  %p322_p2 = scmp.eq.s32.totalorder %s1259_s29, 1 }
   0xb   : > { %p327_p3 = scmp.ne.s32.totalorder %s1153_s26, %s1149_s25  ;;  %p328_p4 = scmp.eq.s32.totalorder %s940_s30, 1 }
   0xc   : > { %s1274_s17 = scalar_select %p309_p1, %s1157_s27, %s311_s15  }
   0xd   : > { %p1276_p5 = por %p322_p2, %p321_p0  ;;  %p1280_p6 = por %p328_p4, %p327_p3 }
   0xe   : > { %p943_p7 = scmp.ge.s32.totalorder %s1161_s28, 1  ;;  %p389_p8 = scmp.lt.s32.totalorder %s1161_s28, 3 }
  0x10   : > { %p390_p9 = pnand %p943_p7, %p389_p8 }
  0x11   : > { %p432_p10 = scmp.lt.s32.totalorder (!%p390_p9), %s1259_s29, 1  ;;  %vm461_vm0 = vcmask (!%p390_p9), 261120   ;;  %s1458_s0 = sld [smem:[#allocation6_spill]] (!%p390_p9)  ;;  %v440_v7 = vld [vmem:[%s1442_s3] sm:$0xff] (!%p390_p9)  ;;  %vm500_vm1 = vcmask (!%p390_p9), 64512   ;;  %v1163_v9 = vmov (!%p390_p9), 0  }
  0x12   : > { %393 = sbr.rel (%p390_p9) target bundleno = 1580 (0x62c), region = 72  ;;  %983 = vmatprep.mubr.msk.f32.mxu0 (!%p390_p9), %vm500_vm1, %v440_v7  ;;  %v442_v8 = vld [vmem:[%s1443_s4] sm:$0xff] (!%p390_p9)  ;;  %1087 = vset.pattern.permute.xlu1 (!%p390_p9), %v1163_v9  ;;  %v443_v10 = vld [vmem:[%s1443_s4 + $0x8] sm:$0xff] (!%p390_p9)  ;;  %s1459_s1 = sld [smem:[#allocation7_spill]] (!%p390_p9)  ;;  %v1164_v21 = vmov (!%p390_p9), 0.0|0.0   ;;  %vm1165_vm2 = vmmov (!%p390_p9), 0  }
  0x13   : > { %1088 = vset.pattern.permute.xlu0 (!%p390_p9), %v1163_v9  ;;  %492 = vperm.xlu1 (!%p390_p9), %1087, %v442_v8   ;;  %s1460_s2 = sld [smem:[#allocation8_spill]] (!%p390_p9)  ;;  %v441_v20 = vld [vmem:[%s1442_s3 + $0x8] sm:$0xff] (!%p390_p9)  ;;  %v1166_v22 = vmov (!%p390_p9), 0.0   ;;  %v445_v23 = vld [vmem:[%s1445_s6] sm:$0xff] (!%p390_p9)  ;;  %vm597_vm3 = vcmask (!%p390_p9), 130048   ;;  %v448_v57 = vld [vmem:[%s1448_s9 + $0x10] sm:$0xff] (!%p390_p9) }
  0x14   : > { %1032 = vmatprep.subr.bf16.mxu1 (!%p390_p9), %v1164_v21  ;;  %1020 = vmatprep.mubr.msk.f32.mxu1 (!%p390_p9), %vm1165_vm2, %v1166_v22  ;;  %v444_v41 = vld [vmem:[%s1444_s5] sm:$0xff] (!%p390_p9)  ;;  %v447_v55 = vld [vmem:[%s1448_s9 + $0x8] sm:$0xff] (!%p390_p9)  ;;  %v449_v58 = vld [vmem:[%s1448_s9 + $0x18] sm:$0xff] (!%p390_p9)  ;;  %vm791_vm4 = vcmask (!%p390_p9), 523264   ;;  %s429_s23 = sand.u32 (!%p390_p9), 1, %s1153_s26   ;;  %s958_s16 = sshll.u32 (!%p390_p9), %s1259_s29, 7 }
  0x15   : > { %v446_v54 = vld [vmem:[%s1448_s9] sm:$0xff] (!%p390_p9)  ;;  %v1030_v59 = vpack.c.bf16 (!%p390_p9), %v449_v58, %v448_v57  ;;  %v453_v8 = vld [vmem:[%s1450_s11 + $0x10] sm:$0xff] (!%p390_p9)  ;;  %v454_v9 = vld [vmem:[%s1450_s11 + $0x18] sm:$0xff] (!%p390_p9)  ;;  %s868_s30 = scalar_lea.sflag (!%p390_p9), [#allocation4], %s429_s23 }
  0x16   : > { %v1027_v56 = vpack.c.bf16 (!%p390_p9), %v447_v55, %v446_v54 }
  0x17   : > { %497 = vperm.xlu1 (!%p390_p9), %1087, %v443_v10   ;;  %v1036_v10 = vpack.c.bf16 (!%p390_p9), %v454_v9, %v453_v8 }
  0x18   : > { %v946_v15 = vld [vmem:[%s1459_s1] ss:$0 sm:$0xff] (!%p390_p9)  ;;  %s1396_s1 = scalar_lea.hbm (!%p390_p9), %s1452_s13, %s958_s16 }
  0x19   : > { %s433_s20 = scalar_select %p432_p10, %s1259_s29, 1  ;;  %v947_v17 = vld [vmem:[%s1460_s2] ss:$0 sm:$0xff] }
  0x1b   : > { %s945_s21 = sshll.u32 %s433_s20, 3 }
  0x1c   : > { %s435_s24 = scalar_lea.vmem %s1458_s0, %s945_s21 }
  0x1d   : > { %v1291_v0 = vld [vmem:[%s435_s24] sm:$0xff]  ;;  %s944_s24 = sshll.u32 %s429_s23, 3 }
  0x1e   : > { %v462_v1 = vsel %vm461_vm0, %v1291_v0, 0.0  ;;  %s431_s20 = scalar_lea.vmem [#allocation3], %s944_s24  ;;  %s1167_s24 = smov [#allocation3]  }
  0x1f   : > { %463 = vadd.xlane.f32.xlu0 %v462_v1  ;;  %s881_s21 = sshll.u32 %s431_s20, 4  ;;  %s1103_s15 = sshll.u32 %s1167_s24, 4  ;;  %s1398_s21 = int_to_ptr.vmem [resolvable:$true] %s881_s21  ;;  %s1104_s15 = int_to_ptr.vmem [resolvable:$false] %s1103_s15 }
  0x20   : > { %s1099_s29 = scalar_lea.vmem %s1398_s21, 128  ;;  %s1105_s2 = scalar_lea.vmem %s1104_s15, 256 }
  0x21   : > { %p1100_p11 = scmp.ne.s32.totalorder %s1398_s21, %s1099_s29  ;;  %p1106_p0 = scmp.lt.s32.totalorder %s1398_s21, %s1104_s15 }
  0x22   : > { %p1107_p1 = scmp.lt.s32.totalorder %s1105_s2, %s1099_s29 }
  0x23   : > { %p1101_p12 = pnand %p1100_p11, %p1276_p5 }
  0x24   : > { %p1108_p2 = por %p1107_p1, %p1106_p0 }
  0x25   : > { %p1102_p13 = pneg %p1101_p12 }
  0x27   : > { %p1109_p3 = pnand %p1108_p2, %p1102_p13 }
  0x92   : > { %v493_v24 = vpop.permute.xlu1 %492 }
  0x96   : > { %v498_v25 = vpop.permute.xlu1 %497 }
  0xac   : > { %v464_v2 = vpop.xlane.xlu0 %463 }
  0xad   : > { %v466_v3 = vmul.f32 0.03125, %v464_v2  ;;  %v952_v2 = vld [vmem:[%s1447_s8] ss:$0 sm:$0xff] }
  0xaf   : > { %v467_v4 = vsub.f32 %v1291_v0, %v466_v3 }
  0xb1   : > { %v468_v5 = vmul.f32 %v467_v4, %v467_v4 }
  0xb3   : > { %v469_v6 = vsel %vm461_vm0, %v468_v5, 0.0  ;;  %v451_v5 = vld [vmem:[%s1450_s11] sm:$0xff] }
  0xb4   : > { %470 = vadd.xlane.f32.xlu0 %v469_v6  ;;  %v452_v6 = vld [vmem:[%s1450_s11 + $0x8] sm:$0xff] }
  0xb5   : > { %v1033_v7 = vpack.c.bf16 %v452_v6, %v451_v5 }
  0xb7   : > { %1034 = vmatpush3.bf16.msra.mxu1 %v1033_v7 }
  0xb8   : > { %1035 = vmatprep.subr.bf16.mxu1 %v1164_v21 }
  0xbb   : > { %1037 = vmatpush3.bf16.msra.mxu1 %v1036_v10 }
  0xbc   : > { %1038 = vmatprep.subr.bf16.mxu1 %v1164_v21 }
  0xca   : > { %594 = vperm.xlu0 %1088, %v445_v23  }
 0x141   : > { %v471_v11 = vpop.xlane.xlu0 %470 }
 0x142   : > { %v472_v12 = vmul.f32 0.03125, %v471_v11  ;;  %v455_v11 = vld [vmem:[%s1450_s11 + $0x20] sm:$0xff] }
 0x144   : > { %v473_v13 = vadd.f32 1e-06, %v472_v12  ;;  %v456_v12 = vld [vmem:[%s1450_s11 + $0x28] sm:$0xff] }
 0x146   : > { %1089 = vrsqrt.f32 %v473_v13  ;;  %v1039_v13 = vpack.c.bf16 %v456_v12, %v455_v11 }
 0x148   : > { %1040 = vmatpush3.bf16.msra.mxu1 %v1039_v13 }
 0x149   : > { %v595_v42 = vpop.permute.xlu0 %594  ;;  %1041 = vmatprep.subr.bf16.mxu1 %v1164_v21 }
 0x150   : > { %v1090_v14 = vpop.eup %1089 }
 0x151   : > { %v475_v16 = vmul.f32 %v1090_v14, %v467_v4  ;;  %v457_v14 = vld [vmem:[%s1450_s11 + $0x30] sm:$0xff] }
 0x153   : > { %v482_v18 = vmul.f32 %v946_v15, %v475_v16  ;;  %v458_v15 = vld [vmem:[%s1450_s11 + $0x38] sm:$0xff] }
 0x154   : > { %v1042_v16 = vpack.c.bf16 %v458_v15, %v457_v14 }
 0x155   : > { %v489_v19 = vadd.f32 %v947_v17, %v482_v18  ;;  %v953_v17 = vld [vmem:[%s1449_s10] ss:$0 sm:$0xff] }
 0x156   : > { %1043 = vmatpush3.bf16.msra.mxu1 %v1042_v16 }
 0x157   : > { %981 = vmatprep.subr.mxu0 %v489_v19 }
 0x158   : > { %982 = vmatpush3.msra.mxu0 %v489_v19 }
 0x159   : > { %984 = vmatmul.mubr.msk.f32.vlgmr.msra.gmra.mrb[0].mxu0 %vm500_vm1, %v441_v20  ;;  %1023 = vmatprep.subr.bf16.mxu0 %v1164_v21 }
 0x15a   : > { %990 = vmatprep.mubr.msk.f32.mxu0 %vm1165_vm2, %v1166_v22 }
 0x22c   : > { %v985_v26 = vpop.f32.mrb[0].mxu0 }
 0x22d   : > { %v579_v27 = vadd.f32 %v985_v26, %v498_v25  ;;  %v573_v28 = vpop.f32.mrb[1].mxu0  ;;  %v955_v26 = vld [vmem:[%s1451_s12] ss:$0 sm:$0xff] }
 0x22e   : > { %v574_v29 = vadd.f32 %v573_v28, %v493_v24 }
 0x22f   : > { %v585_v30 = vmul.f32 0.70710677, %v579_v27  ;;  %v583_v34 = vmul.f32 0.5, %v579_v27 }
 0x230   : > { %v584_v31 = vmul.f32 0.70710677, %v574_v29  ;;  %v582_v36 = vmul.f32 0.5, %v574_v29 }
 0x231   : > { %1091 = verf.f32 %v585_v30 }
 0x232   : > { %1093 = verf.f32 %v584_v31 }
 0x23b   : > { %v1092_v32 = vpop.eup %1091 }
 0x23c   : > { %v1094_v33 = vpop.eup %1093  ;;  %v589_v35 = vadd.f32 1.0, %v1092_v32 }
 0x23d   : > { %v588_v37 = vadd.f32 1.0, %v1094_v33 }
 0x23e   : > { %v591_v38 = vmul.f32 %v589_v35, %v583_v34 }
 0x23f   : > { %v590_v39 = vmul.f32 %v588_v37, %v582_v36 }
 0x241   : > { %v1024_v40 = vpack.c.bf16 %v591_v38, %v590_v39 }
 0x243   : > { %1025 = vmatpush3.bf16.msra.mxu0 %v1024_v40 }
 0x244   : > { %1026 = vmatprep.subr.bf16.mxu0 %v1164_v21 }
 0x246   : > { %991 = vmatmul.mubr.msk.f32.vlgmr.msra.gmra.mrb[2].mxu0 %vm597_vm3, %v444_v41 }
 0x247   : > { %1001 = vmatprep.mubr.msk.f32.mxu0 %vm1165_vm2, %v1166_v22  ;;  %1028 = vmatpush3.bf16.msra.mxu0 %v1027_v56 }
 0x248   : > { %1029 = vmatprep.subr.bf16.mxu0 %v1164_v21 }
 0x24b   : > { %1031 = vmatpush3.bf16.msra.mxu0 %v1030_v59 }
 0x319   : > { %v667_v43 = vpop.f32.mrb[2].mxu0 }
 0x31a   : > { %v668_v44 = vadd.f32 %v667_v43, %v595_v42  ;;  %v992_v45 = vpop.f32.mrb[3].mxu0 }
 0x31c   : > { %v671_v46 = vadd.f32 %v668_v44, %v1291_v0  ;;  %v951_v0 = vld [vmem:[%s1446_s7] ss:$0 sm:$0xff] }
 0x31e   : > { %672 = vst.msk [vmem:[#allocation2] sm:$0xff] %vm461_vm0, %v671_v46 }
 0x325   : > { %v1331_v47 = vld [vmem:[#allocation2] sm:$0xff] }
 0x326   : > { %v674_v48 = vsel %vm461_vm0, %v1331_v47, 0.0 }
 0x327   : > { %675 = vadd.xlane.f32.xlu1 %v674_v48 }
 0x3b4   : > { %v676_v49 = vpop.xlane.xlu1 %675 }
 0x3b5   : > { %v677_v50 = vmul.f32 0.03125, %v676_v49 }
 0x3b7   : > { %v678_v51 = vsub.f32 %v1331_v47, %v677_v50 }
 0x3b9   : > { %v679_v52 = vmul.f32 %v678_v51, %v678_v51 }
 0x3bb   : > { %v680_v53 = vsel %vm461_vm0, %v679_v52, 0.0 }
 0x3bc   : > { %681 = vadd.xlane.f32.xlu1 %v680_v53 }
 0x449   : > { %v682_v60 = vpop.xlane.xlu1 %681 }
 0x44a   : > { %v683_v61 = vmul.f32 0.03125, %v682_v60 }
 0x44c   : > { %v684_v62 = vadd.f32 1e-06, %v683_v61 }
 0x44e   : > { %1095 = vrsqrt.f32 %v684_v62 }
 0x458   : > { %v1096_v63 = vpop.eup %1095 }
 0x459   : > { %v686_v1 = vmul.f32 %v1096_v63, %v678_v51 }
 0x45b   : > { %v693_v3 = vmul.f32 %v951_v0, %v686_v1 }
 0x45d   : > { %v700_v4 = vadd.f32 %v952_v2, %v693_v3 }
 0x45f   : > { %1002 = vmatmul.mubr.msk.f32.vlgmr.msra.gmra.mrb[4].mxu0 %vm461_vm0, %v700_v4 }
 0x532   : > { %v776_v18 = vpop.f32.mrb[4].mxu0 }
 0x533   : > { %v777_v19 = vadd.f32 %v953_v17, %v776_v18  ;;  %v1003_v20 = vpop.f32.mrb[5].mxu0 }
 0x535   : > { %v781_v21 = vmul.f32 0.70710677, %v777_v19  ;;  %v780_v23 = vmul.f32 0.5, %v777_v19 }
 0x537   : > { %1097 = verf.f32 %v781_v21 }
 0x541   : > { %v1098_v22 = vpop.eup %1097 }
 0x542   : > { %v783_v24 = vadd.f32 1.0, %v1098_v22 }
 0x544   : > { %v784_v25 = vmul.f32 %v783_v24, %v780_v23 }
 0x546   : > { %1021 = vmatmul.mubr.msk.f32.vlgmr.msra.gmra.mrb[0].mxu1 %vm791_vm4, %v784_v25 }
 0x619   : > { %v861_v27 = vpop.f32.mrb[0].mxu1 }
 0x61a   : > { %v862_v28 = vadd.f32 %v955_v26, %v861_v27  ;;  %v1022_v29 = vpop.f32.mrb[1].mxu1 }
 0x61c   : > { %v865_v30 = vadd.f32 %v862_v28, %v1331_v47 }
 0x61e   : > { %866 = vst.msk [vmem:[%s431_s20] sm:$0xff] %vm461_vm0, %v865_v30 }
 0x61f   : > { %1112 = shalt.err (!%p1109_p3)
}
 0x620   : > { %s1113_s0 = scalar_lea.hbm %s1396_s1, 128  ;;  %s1117_s20 = scalar_lea.hbm %s1452_s13, 256 }
 0x621   : > { %p1114_p4 = scmp.ne.s32.totalorder %s1396_s1, %s1113_s0  ;;  %p1118_p9 = scmp.lt.u32.totalorder %s1396_s1, %s1452_s13 }
 0x622   : > { %p1119_p10 = scmp.lt.u32.totalorder %s1117_s20, %s1113_s0  ;;  %p1121_p12 = scmp.lt.u32.totalorder %s1113_s0, %s1396_s1 }
 0x623   : > { %p1115_p7 = pnand %p1114_p4, %p1276_p5 }
 0x624   : > { %p1120_p11 = por %p1119_p10, %p1118_p9 }
 0x625   : > { %p1116_p8 = pneg %p1115_p7 }
 0x626   : > { %p1122_p13 = por %p1121_p12, %p1120_p11 }
 0x628   : > { %p1123_p0 = pnand %p1122_p13, %p1116_p8 }
 0x62a   : > { %1126 = shalt.err (!%p1123_p0)
}
 0x62b   : > { %1044 = dma.vmem_to_hbm [thread:$0]  (%p1276_p5), %s1398_s21, 128, %s1396_s1, %s868_s30  }
 0x62c PF: > { %p1050_p1 = scmp.ge.s32.totalorder %s1161_s28, 2  ;;  %s893_s2 = sand.u32 1, %s1149_s25  }
 0x62d   : > { %s894_s29 = scalar_lea.sflag [#allocation4], %s893_s2 }
 0x62e   : > { %p1047_p2 = pnand %p1050_p1, %p1280_p6 }
 0x630   : > { %1144 = dma.done.wait (!%p1047_p2), %s894_s29, 128  }
 0x631   : > { %1146 = vsyncadd (!%p1047_p2), %s894_s29, 4294967168  ;;  %p23_p3 = scmp.ge.s32.totalorder %s1263_s14, 4   ;;  %s1461_s25 = smov %s1153_s26 }
 0x632   : > { %s1462_s26 = smov %s1157_s27  ;;  %s1463_s27 = smov %s1274_s17 }
 0x633   : > { %s1464_s28 = smov %s1263_s14  ;;  %25 = sbr.rel (!%p23_p3) target bundleno = 7 (0x7), region = 107 }
 0x63a   :  { %899 = vsyncpa [#allocation4], 1 }
 0x63b   :  { %901 = vsyncpa [#allocation4 + $0x1], 1 }

</bundles_post_ra>
